<compile_context>
chip_gen: v6e
topology: v6e:2x2x1
jax: 0.10.0
libtpu: 0.0.40
codegen_flags: <defaults>
</compile_context>

<pallas_src>
import functools
import math

import jax
import jax.numpy as jnp
from jax import lax
from jax.experimental import pallas as pl
from jax.experimental.pallas import tpu as pltpu


def _round_up(x, m):
    return ((x + m - 1) // m) * m


def _vmem_limit(nbytes):
    # Explicit scoped-VMEM budget: floor at v5e's 16 MiB default, stay well
    # below v7x's 64 MiB physical VMEM.
    return int(min(48 * 1024 * 1024, max(16 * 1024 * 1024, nbytes)))


# ---------------------------------------------------------------------------
# Kernel 1: fused Q/K/V projection.  y = x @ [Wq*scale | Wk | Wv] + biases.
# ---------------------------------------------------------------------------
def _qkv_proj_kernel(x_ref, w_ref, b_ref, q_ref, k_ref, v_ref, *, qk, zv, seg):
    x = x_ref[0]                                                    # (tm, D)
    y = jnp.dot(x, w_ref[...], preferred_element_type=jnp.float32)  # (tm, Ncat)
    y = y + b_ref[...]
    # Segments start at multiples of 128 lanes -> vreg-aligned slices/stores.
    q_ref[0] = y[:, :qk].astype(q_ref.dtype)
    k_ref[0] = y[:, seg:seg + qk].astype(k_ref.dtype)
    v_ref[0] = y[:, 2 * seg:2 * seg + zv].astype(v_ref.dtype)


# ---------------------------------------------------------------------------
# Kernel 2: flash-style attention with online softmax.
#   grid = (B, Sq_tiles, Skv_tiles); kv axis is the reduction ("arbitrary").
# ---------------------------------------------------------------------------
def _online_softmax_update(s, col_mask, v, m_sc, l_sc, acc_sc, *, zv):
    m_prev = m_sc[...]                                              # (tq, 128)
    m_new = jnp.maximum(m_prev, jnp.max(s, axis=-1, keepdims=True))
    alpha = jnp.exp(m_prev - m_new)                                 # (tq, 128)
    lanes = s.shape[1]
    m_rep = m_new[:, :lanes] if lanes <= m_new.shape[1] else m_new[:, :1]
    p = jnp.exp(s - m_rep)                                          # (tq, tk)
    if col_mask is not None:
        # Zeroing p (instead of adding -1e30 to s) keeps the update correct
        # for any iteration order, even a fully-padded tile.
        p = jnp.where(col_mask, p, 0.0)
    l_sc[...] = alpha * l_sc[...] + jnp.sum(p, axis=-1, keepdims=True)
    a_out = alpha[:, :zv] if zv <= alpha.shape[1] else alpha[:, :1]
    acc_sc[...] = a_out * acc_sc[...] + jnp.dot(
        p.astype(v.dtype), v, preferred_element_type=jnp.float32)
    m_sc[...] = m_new


def _flash_attn_kernel(q_ref, k_ref, v_ref, o_ref, m_sc, l_sc, acc_sc,
                       *, tk, seq_len, needs_mask, zv):
    kv = pl.program_id(2)
    last_kv = pl.num_programs(2) - 1

    @pl.when(kv == 0)
    def _():
        m_sc[...] = jnp.full(m_sc.shape, -jnp.inf, jnp.float32)
        l_sc[...] = jnp.zeros(l_sc.shape, jnp.float32)
        acc_sc[...] = jnp.zeros(acc_sc.shape, jnp.float32)

    q = q_ref[0]                                                    # (tq, QK)
    k = k_ref[0]                                                    # (tk, QK)
    v = v_ref[0]                                                    # (tk, ZV)

    # Q.K^T expressed as an NT contraction (no explicit transpose).
    # TODO(synk): emit K pre-transposed from the projection kernel if a bundle
    # dump ever shows a per-step vxpose here.
    s = lax.dot_general(q, k, (((1,), (1,)), ((), ())),
                        preferred_element_type=jnp.float32)         # (tq, tk)

    if needs_mask:
        # Padding only ever lives in the final kv tile; interior tiles skip
        # the iota/compare/select entirely.
        @pl.when(kv != last_kv)
        def _():
            _online_softmax_update(s, None, v, m_sc, l_sc, acc_sc, zv=zv)

        @pl.when(kv == last_kv)
        def _():
            col = kv * tk + lax.broadcasted_iota(jnp.int32, s.shape, 1)
            _online_softmax_update(s, col < seq_len, v, m_sc, l_sc, acc_sc,
                                   zv=zv)
    else:
        _online_softmax_update(s, None, v, m_sc, l_sc, acc_sc, zv=zv)

    @pl.when(kv == last_kv)
    def _():
        l = l_sc[...]
        inv = pl.reciprocal(l, approx=True)          # EUP slot (otherwise idle)
        # Two Newton steps restore f32 accuracy; epilogue-only, negligible.
        inv = inv * (2.0 - l * inv)
        inv = inv * (2.0 - l * inv)
        inv_o = inv[:, :zv] if zv <= inv.shape[1] else inv[:, :1]
        o_ref[0] = (acc_sc[...] * inv_o).astype(o_ref.dtype)


# ---------------------------------------------------------------------------
# Wrapper.  Weights stored as (in_features, out_features): y = x @ W + b,
# identical to torch's x @ W_t.T + b.
# ---------------------------------------------------------------------------
def attention_head(x, wq, bq, wk, bk, wv, bv, *, qk_size,
                   block_q=512, block_kv=128, block_m=512):
    B, S, D = x.shape
    QK = wq.shape[1]
    ZV = wv.shape[1]
    dtype = x.dtype
    scale = 1.0 / math.sqrt(float(qk_size))

    # ---- fused projection weights: [Wq*scale | Wk | Wv], 128-aligned segs ---
    seg = _round_up(QK, 128)
    ncat = 2 * seg + ZV
    w_cat = jnp.zeros((D, ncat), dtype)
    w_cat = w_cat.at[:, :QK].set((wq * scale).astype(dtype))
    w_cat = w_cat.at[:, seg:seg + QK].set(wk.astype(dtype))
    w_cat = w_cat.at[:, 2 * seg:2 * seg + ZV].set(wv.astype(dtype))
    b_cat = jnp.zeros((1, ncat), dtype)
    b_cat = b_cat.at[0, :QK].set((bq * scale).astype(dtype))
    b_cat = b_cat.at[0, seg:seg + QK].set(bk.astype(dtype))
    b_cat = b_cat.at[0, 2 * seg:2 * seg + ZV].set(bv.astype(dtype))
    # TODO(synk): cast x/w_cat (and P/V) to bfloat16 for native-rate MXU if
    # callers tolerate it; kept f32 to preserve the nn.Module's numerics.

    # ---- tile selection -----------------------------------------------------
    block_kv = max(8, _round_up(block_kv, 8))
    block_q = max(block_kv, _round_up(block_q, block_kv))
    block_m = max(8, _round_up(block_m, 8))

    s_r8 = _round_up(S, 8)
    if s_r8 <= block_kv:
        tk = tq = s_r8                        # whole sequence in one kv tile
    else:
        tk = block_kv
        tq = min(block_q, _round_up(S, tk))   # tall-skinny score tile (tk | tq)
    Sp = _round_up(S, tq)
    # v7x has two TensorCores: make sure the "parallel" grid extent is >= 2.
    if B * (Sp // tq) < 2 and tq > tk:
        tq = max(tk, ((tq // 2) // tk) * tk)
        Sp = _round_up(S, tq)
    n_kv = pl.cdiv(S, tk)                     # kv grid only covers valid rows
    needs_mask = (S % tk) != 0

    tm = min(block_m, Sp)                     # projection row tile
    if Sp % tm != 0:
        tm = tq

    x_p = x if Sp == S else jnp.pad(x, ((0, 0), (0, Sp - S), (0, 0)))

    # ---- kernel 1: fused QKV projection, written directly in (B, Sp, .) -----
    proj_bytes = 4 * (2 * tm * D + 2 * D * ncat + 2 * ncat
                      + 2 * tm * (2 * QK + ZV) + tm * ncat)
    # TODO(synk): mark the w_cat/b_cat specs pipeline_mode=pl.Buffered(1)
    # (constant index_map) once single-buffered resident operands are safe on
    # the installed jax; it would halve their VMEM footprint.
    q3, k3, v3 = pl.pallas_call(
        functools.partial(_qkv_proj_kernel, qk=QK, zv=ZV, seg=seg),
        out_shape=(jax.ShapeDtypeStruct((B, Sp, QK), dtype),
                   jax.ShapeDtypeStruct((B, Sp, QK), dtype),
                   jax.ShapeDtypeStruct((B, Sp, ZV), dtype)),
        grid_spec=pltpu.PrefetchScalarGridSpec(
            num_scalar_prefetch=0,
            grid=(B, Sp // tm),
            in_specs=[
                pl.BlockSpec((1, tm, D), lambda b, i: (b, i, 0)),     # x rows
                pl.BlockSpec((D, ncat), lambda b, i: (0, 0)),         # W_cat
                pl.BlockSpec((1, ncat), lambda b, i: (0, 0)),         # b_cat
            ],
            out_specs=(pl.BlockSpec((1, tm, QK), lambda b, i: (b, i, 0)),
                       pl.BlockSpec((1, tm, QK), lambda b, i: (b, i, 0)),
                       pl.BlockSpec((1, tm, ZV), lambda b, i: (b, i, 0))),
        ),
        compiler_params=pltpu.CompilerParams(
            dimension_semantics=("parallel", "parallel"),
            vmem_limit_bytes=_vmem_limit(2 * proj_bytes)),
    )(x_p, w_cat, b_cat)

    # ---- kernel 2: flash attention (no HBM relayout of Q/K/V in between) ----
    attn_bytes = 4 * (2 * (tq * QK + tk * QK + tk * ZV + tq * ZV)
                      + 2 * tq * 128 + tq * ZV + 2 * tq * tk)
    out = pl.pallas_call(
        functools.partial(_flash_attn_kernel, tk=tk, seq_len=S,
                          needs_mask=needs_mask, zv=ZV),
        out_shape=jax.ShapeDtypeStruct((B, Sp, ZV), dtype),
        grid_spec=pltpu.PrefetchScalarGridSpec(
            num_scalar_prefetch=0,
            grid=(B, Sp // tq, n_kv),
            in_specs=[
                pl.BlockSpec((1, tq, QK), lambda b, qi, ki: (b, qi, 0)),
                pl.BlockSpec((1, tk, QK), lambda b, qi, ki: (b, ki, 0)),
                pl.BlockSpec((1, tk, ZV), lambda b, qi, ki: (b, ki, 0)),
            ],
            out_specs=pl.BlockSpec((1, tq, ZV), lambda b, qi, ki: (b, qi, 0)),
            scratch_shapes=[
                pltpu.VMEM((tq, 128), jnp.float32),   # running max (lane-repl)
                pltpu.VMEM((tq, 128), jnp.float32),   # running denom
                pltpu.VMEM((tq, ZV), jnp.float32),    # output accumulator
            ],
        ),
        compiler_params=pltpu.CompilerParams(
            dimension_semantics=("parallel", "parallel", "arbitrary"),
            vmem_limit_bytes=_vmem_limit(2 * attn_bytes)),
    )(q3, k3, v3)

    return out if Sp == S else out[:, :S, :]


def attention_head_ref(x, wq, bq, wk, bk, wv, bv, *, qk_size):
    q = x @ wq + bq
    k = x @ wk + bk
    v = x @ wv + bv
    e = jnp.einsum("bqd,bkd->bqk", q, k) / jnp.sqrt(jnp.float32(qk_size))
    p = jax.nn.softmax(e, axis=-1)
    return jnp.einsum("bqk,bkd->bqd", p, v)


if __name__ == "__main__":
    def _run_case(B, S, x_size, qk_size, zv_size, seed):
        key = jax.random.PRNGKey(seed)
        kx, kwq, kbq, kwk, kbk, kwv, kbv = jax.random.split(key, 7)
        x = jax.random.normal(kx, (B, S, x_size), dtype=jnp.float32)
        # torch nn.Linear default init: U(-1/sqrt(in), 1/sqrt(in))
        bound = 1.0 / (x_size ** 0.5)
        wq = jax.random.uniform(kwq, (x_size, qk_size), minval=-bound, maxval=bound)
        bq = jax.random.uniform(kbq, (qk_size,), minval=-bound, maxval=bound)
        wk = jax.random.uniform(kwk, (x_size, qk_size), minval=-bound, maxval=bound)
        bk = jax.random.uniform(kbk, (qk_size,), minval=-bound, maxval=bound)
        wv = jax.random.uniform(kwv, (x_size, zv_size), minval=-bound, maxval=bound)
        bv = jax.random.uniform(kbv, (zv_size,), minval=-bound, maxval=bound)

        out = attention_head(x, wq, bq, wk, bk, wv, bv, qk_size=qk_size)
        out = jax.block_until_ready(out)
        ref = attention_head_ref(x, wq, bq, wk, bk, wv, bv, qk_size=qk_size)
        assert out.shape == (B, S, zv_size), (out.shape, (B, S, zv_size))
        err = float(jnp.max(jnp.abs(out - ref)))
        assert jnp.allclose(out, ref, atol=1e-5, rtol=1e-5), (
            f"mismatch vs reference (max abs err {err:.3e})")

    # Small config implied by the module (batch=2, seq=8, hidden=32).
    _run_case(B=2, S=8, x_size=32, qk_size=16, zv_size=32, seed=0)
    # Exercises seq padding, boundary-tile masking and a multi-tile kv loop.
    _run_case(B=2, S=200, x_size=32, qk_size=16, zv_size=32, seed=0)

    print("KERNEL_OK")
</pallas_src>

<mosaic_0001>
module attributes {stable_mosaic.version = 11 : i64} {
  func.func @_qkv_proj_kernel(%arg0: i32, %arg1: i32, %arg2: memref<1x8x32xf32, #tpu.memory_space<vmem>>, %arg3: memref<32x288xf32, #tpu.memory_space<vmem>>, %arg4: memref<1x288xf32, #tpu.memory_space<vmem>>, %arg5: memref<1x8x16xf32, #tpu.memory_space<vmem>>, %arg6: memref<1x8x16xf32, #tpu.memory_space<vmem>>, %arg7: memref<1x8x32xf32, #tpu.memory_space<vmem>>) attributes {dimension_semantics = [#tpu.dimension_semantics<parallel>, #tpu.dimension_semantics<parallel>], iteration_bounds = array<i64: 2, 1>, scalar_prefetch = 0 : i64, scratch_operands = 0 : i64, tpu.core_type = #tpu.core_type<tc>, window_params = [{transform_indices = @transform_0, window_bounds = array<i64: 1, 8, 32>}, {pipeline_mode = #tpu.pipeline_mode<synchronous>, transform_indices = @transform_1, window_bounds = array<i64: 32, 288>}, {pipeline_mode = #tpu.pipeline_mode<synchronous>, transform_indices = @transform_2, window_bounds = array<i64: 1, 288>}, {transform_indices = @transform_3, window_bounds = array<i64: 1, 8, 16>}, {transform_indices = @transform_4, window_bounds = array<i64: 1, 8, 16>}, {transform_indices = @transform_5, window_bounds = array<i64: 1, 8, 32>}]} {
    %c0 = arith.constant 0 : index
    %c0_0 = arith.constant 0 : index
    %c0_1 = arith.constant 0 : index
    %0 = vector.load %arg2[%c0, %c0_0, %c0_1] : memref<1x8x32xf32, #tpu.memory_space<vmem>>, vector<1x8x32xf32>
    %1 = vector.shape_cast %0 : vector<1x8x32xf32> to vector<8x32xf32>
    %c0_2 = arith.constant 0 : index
    %c0_3 = arith.constant 0 : index
    %2 = vector.load %arg3[%c0_2, %c0_3] : memref<32x288xf32, #tpu.memory_space<vmem>>, vector<32x288xf32>
    %cst = arith.constant dense<0.000000e+00> : vector<8x288xf32>
    %3 = tpu.matmul %1, %2, %cst {dimension_numbers = #tpu.dot_dimension_numbers<[1], [0], [0], [1], [0, 0, 1, 1], [], []>} : vector<8x32xf32>, vector<32x288xf32>, vector<8x288xf32> -> vector<8x288xf32>
    %c0_4 = arith.constant 0 : index
    %c0_5 = arith.constant 0 : index
    %4 = vector.load %arg4[%c0_4, %c0_5] : memref<1x288xf32, #tpu.memory_space<vmem>>, vector<1x288xf32>
    %5 = vector.broadcast %4 : vector<1x288xf32> to vector<8x288xf32>
    %6 = arith.addf %3, %5 : vector<8x288xf32>
    %7 = vector.extract_strided_slice %6 {offsets = [0, 0], sizes = [8, 16], strides = [1, 1]} : vector<8x288xf32> to vector<8x16xf32>
    %c0_6 = arith.constant 0 : index
    %c0_7 = arith.constant 0 : index
    %c0_8 = arith.constant 0 : index
    %8 = vector.load %arg5[%c0_6, %c0_7, %c0_8] : memref<1x8x16xf32, #tpu.memory_space<vmem>>, vector<1x8x16xf32>
    %9 = vector.shape_cast %8 : vector<1x8x16xf32> to vector<8x16xf32>
    %10 = vector.shape_cast %7 : vector<8x16xf32> to vector<1x8x16xf32>
    tpu.vector_store %arg5[%c0_6, %c0_7, %c0_8], %10 {strides = array<i32>} : memref<1x8x16xf32, #tpu.memory_space<vmem>>, vector<1x8x16xf32>,
    %11 = vector.extract_strided_slice %6 {offsets = [0, 128], sizes = [8, 16], strides = [1, 1]} : vector<8x288xf32> to vector<8x16xf32>
    %c0_9 = arith.constant 0 : index
    %c0_10 = arith.constant 0 : index
    %c0_11 = arith.constant 0 : index
    %12 = vector.load %arg6[%c0_9, %c0_10, %c0_11] : memref<1x8x16xf32, #tpu.memory_space<vmem>>, vector<1x8x16xf32>
    %13 = vector.shape_cast %12 : vector<1x8x16xf32> to vector<8x16xf32>
    %14 = vector.shape_cast %11 : vector<8x16xf32> to vector<1x8x16xf32>
    tpu.vector_store %arg6[%c0_9, %c0_10, %c0_11], %14 {strides = array<i32>} : memref<1x8x16xf32, #tpu.memory_space<vmem>>, vector<1x8x16xf32>,
    %15 = vector.extract_strided_slice %6 {offsets = [0, 256], sizes = [8, 32], strides = [1, 1]} : vector<8x288xf32> to vector<8x32xf32>
    %c0_12 = arith.constant 0 : index
    %c0_13 = arith.constant 0 : index
    %c0_14 = arith.constant 0 : index
    %16 = vector.load %arg7[%c0_12, %c0_13, %c0_14] : memref<1x8x32xf32, #tpu.memory_space<vmem>>, vector<1x8x32xf32>
    %17 = vector.shape_cast %16 : vector<1x8x32xf32> to vector<8x32xf32>
    %18 = vector.shape_cast %15 : vector<8x32xf32> to vector<1x8x32xf32>
    tpu.vector_store %arg7[%c0_12, %c0_13, %c0_14], %18 {strides = array<i32>} : memref<1x8x32xf32, #tpu.memory_space<vmem>>, vector<1x8x32xf32>,
    return
  }
  func.func @transform_0(%arg0: i32, %arg1: i32) -> (i32, i32, i32) {
    %c0_i32 = arith.constant 0 : i32
    %c0_i32_0 = arith.constant 0 : i32
    return %arg0, %arg1, %c0_i32 : i32, i32, i32
  }
  func.func @transform_1(%arg0: i32, %arg1: i32) -> (i32, i32) {
    %c0_i32 = arith.constant 0 : i32
    %c0_i32_0 = arith.constant 0 : i32
    %c0_i32_1 = arith.constant 0 : i32
    return %c0_i32, %c0_i32_0 : i32, i32
  }
  func.func @transform_2(%arg0: i32, %arg1: i32) -> (i32, i32) {
    %c0_i32 = arith.constant 0 : i32
    %c0_i32_0 = arith.constant 0 : i32
    %c0_i32_1 = arith.constant 0 : i32
    return %c0_i32, %c0_i32_0 : i32, i32
  }
  func.func @transform_3(%arg0: i32, %arg1: i32) -> (i32, i32, i32) {
    %c0_i32 = arith.constant 0 : i32
    %c0_i32_0 = arith.constant 0 : i32
    return %arg0, %arg1, %c0_i32 : i32, i32, i32
  }
  func.func @transform_4(%arg0: i32, %arg1: i32) -> (i32, i32, i32) {
    %c0_i32 = arith.constant 0 : i32
    %c0_i32_0 = arith.constant 0 : i32
    return %arg0, %arg1, %c0_i32 : i32, i32, i32
  }
  func.func @transform_5(%arg0: i32, %arg1: i32) -> (i32, i32, i32) {
    %c0_i32 = arith.constant 0 : i32
    %c0_i32_0 = arith.constant 0 : i32
    return %arg0, %arg1, %c0_i32 : i32, i32, i32
  }
}

</mosaic_0001>

<bundles_post_ra>
// kernel: tpu_custom_call.1
= control target key start
LH: loop header
LB: loop body
LE: loop exit
PB: predicated region body
PF: predicated region fallthrough
CT: control target
= control target key end

     0   :  { %s1300_s0 = inlined_call_operand.hbm [shape: f32[2,8,32], index: 0, kind: input, shape index: {}]   ;;  %s1301_s1 = inlined_call_operand.hbm [shape: f32[32,288], index: 1, kind: input, shape index: {}]   ;;  %s1302_s2 = inlined_call_operand.vmem [shape: f32[1,288], index: 2, kind: input, shape index: {}]   ;;  %s1303_s3 = inlined_call_operand.hbm [shape: f32[2,8,16], index: 3, kind: output, shape index: {0}]   ;;  %s1304_s4 = inlined_call_operand.hbm [shape: f32[2,8,16], index: 4, kind: output, shape index: {1}]   ;;  %s1305_s5 = inlined_call_operand.hbm [shape: f32[2,8,32], index: 5, kind: output, shape index: {2}]  }
   0x1   :  { %1310 = sst [smem:[#allocation16_spill]] %s1300_s0 }
   0x2   :  { %1311 = sst [smem:[#allocation17_spill]] %s1301_s1 }
   0x3   :  { %11 = vsyncpa [#allocation3], 0 }
   0x4   :  { %13 = vsyncpa [#allocation3 + $0x1], 0 }
   0x5   :  { %14 = vsyncpa [#allocation6], 0 }
   0x6   :  { %15 = vsyncpa [#allocation4], 0 }
   0x7   :  { %17 = vsyncpa [#allocation4 + $0x1], 0 }
   0x8   :  { %18 = vsyncpa [#allocation9], 0 }
   0x9   :  { %20 = vsyncpa [#allocation9 + $0x1], 0  ;;  %s1040_s18 = smov 0   ;;  %s1042_s19 = smov 0  }
   0xa   :  { %s1044_s20 = smov 0   ;;  %s1046_s21 = smov 0  }
   0xb   :  { %s1048_s22 = smov 0   ;;  %s1050_s23 = smov 0  }
   0xc LB: > { %s1071_s24 = sadd.s32 4294967295, %s999_s23   ;;  %s1306_s25 = sadd.s32 4294967294, %s999_s23   ;;  %s999_s23 = sphi %s1050_s23, %s26_s23   ;;  %s995_s22 = sphi %s1048_s22, %s1335_s22   ;;  %s991_s21 = sphi %s1046_s21, %s1334_s21   ;;  %s987_s20 = sphi %s1044_s20, %s1333_s20   ;;  %s983_s19 = sphi %s1042_s19, %s1332_s19   ;;  %s979_s18 = sphi %s1040_s18, %s1331_s18  }
   0xd   : > { %p60_p0 = scmp.ne.s32.totalorder %s983_s19, %s979_s18  ;;  %p1308_p1 = scmp.eq.s32.totalorder %s1071_s24, 0 }
   0xe   : > { %p134_p3 = scmp.eq.s32.totalorder %s1306_s25, 1  ;;  %p681_p5 = scmp.ge.s32.totalorder %s999_s23, 1 }
   0xf   : > { %p1082_p4 = por %p1308_p1, %p60_p0  ;;  %p197_p7 = scmp.lt.s32.totalorder %s999_s23, 3 }
  0x10   : > { %p1087_p6 = por %p134_p3, %p60_p0  ;;  %s1001_s29 = smov [#allocation5]  }
  0x11   : > { %p1092_p8 = pnand %p681_p5, %p197_p7  ;;  %s209_s30 = sshll.u32 %s1001_s29, 4  ;;  %s210_s30 = int_to_ptr.vmem [resolvable:$true] %s209_s30 }
  0x12   : > { %s1313_s27 = scalar_select %p1087_p6, 1, 0 }
  0x13   : > { %p730_p9 = pneg %p1092_p8  ;;  %s38_s7 = sadd.s32 1, %s995_s22 }
  0x14   : > { %s816_s8 = scalar_lea.vmem %s210_s30, 1536  ;;  %p824_p5 = scmp.lt.s32.totalorder %s210_s30, %s210_s30 }
  0x15   : > { %p1101_p11 = pnand %p730_p9, %p1308_p1  ;;  %p817_p13 = scmp.ne.s32.totalorder %s210_s30, %s816_s8 }
  0x16   : > { %p825_p7 = scmp.lt.s32.totalorder %s816_s8, %s816_s8 }
  0x17   : > { %p807_p12 = pneg %p1101_p11 }
  0x18   : > { %p826_p2 = por %p825_p7, %p824_p5 }
  0x19   : > { %p819_p0 = pnand %p817_p13, %p807_p12 }
  0x1b   : > { %p820_p3 = pneg %p819_p0 }
  0x1d   : > { %p827_p6 = pnand %p826_p2, %p820_p3 }
  0x1f   : > { %830 = shalt.err (!%p827_p6)
}
  0x20   : > { %s1002_s9 = smov 384   ;;  %s1003_s10 = smov 24  }
  0x21   : > { %s1316_s1 = sld [smem:[#allocation17_spill]]  ;;  %p40_p2 = scmp.ge.s32.totalorder %s38_s7, 2 }
  0x22   : > { %s47_s13 = sadd.s32 1, %s987_s20  ;;  %p54_p6 = scmp.ne.s32.totalorder %s987_s20, %s983_s19 }
  0x23   : > { %p55_p9 = scmp.eq.s32.totalorder %s999_s23, 0  ;;  %s1337_s7 = smov (%p40_p2, %s38_s7), 0 }
  0x24   : > { %1317 = sst [smem:[#allocation15_spill]] %s1337_s7  ;;  %p1319_p13 = scmp.eq.s32.totalorder %s1071_s24, 1 }
  0x25   : > { %p1119_p12 = por %p55_p9, %p54_p6  ;;  %s42_s16 = ssub.s32 %s995_s22, %s1337_s7 }
  0x26   : > { %p1125_p0 = por %p1319_p13, %p54_p6  ;;  %p749_p3 = scmp.lt.s32.totalorder %s999_s23, 2 }
  0x27   : > { %733 = dma.hbm_to_vmem [thread:$0]  (!%p1101_p11), %s1316_s1, 1536, %s210_s30, [#allocation6], %s1002_s9, %s1002_s9, %s1003_s10  }
  0x28   : > { %p45_p11 = scmp.eq.s32.totalorder %s42_s16, 0  ;;  %s226_s17 = sand.u32 1, %s987_s20  }
  0x29   : > { %s684_s29 = sshll.u32 %s226_s17, 3  ;;  %s685_s6 = sshll.u32 %s995_s22, 7 }
  0x2a   : > { %s1134_s30 = scalar_select %p45_p11, %s987_s20, %s47_s13  }
  0x2b   : > { %s1321_s0 = sld [smem:[#allocation16_spill]]  ;;  %s230_s11 = scalar_lea.vmem [#allocation2], %s684_s29 }
  0x2c   : > { %s238_s12 = sshll.u32 %s230_s11, 4  ;;  %p1142_p5 = pnand %p749_p3, %p1119_p12  ;;  %s239_s12 = int_to_ptr.vmem [resolvable:$true] %s238_s12 }
  0x2d   : > { %s227_s1 = scalar_lea.sflag [#allocation3], %s226_s17  ;;  %s844_s16 = scalar_lea.vmem %s239_s12, 128 }
  0x2e   : > { %p833_p7 = pneg %p1142_p5  ;;  %p845_p2 = scmp.ne.s32.totalorder %s239_s12, %s844_s16 }
  0x2f   : > { %s1004_s13 = smov [#allocation2]  }
  0x30   : > { %p847_p6 = pnand %p845_p2, %p833_p7  ;;  %s849_s7 = sshll.u32 %s1004_s13, 4  ;;  %s850_s7 = int_to_ptr.vmem [resolvable:$false] %s849_s7 }
  0x31   : > { %s236_s10 = scalar_lea.hbm %s1321_s0, %s685_s6  ;;  %s851_s6 = scalar_lea.vmem %s850_s7, 256 }
  0x32   : > { %p848_p9 = pneg %p847_p6  ;;  %p852_p13 = scmp.lt.s32.totalorder %s239_s12, %s850_s7 }
  0x33   : > { %p853_p11 = scmp.lt.s32.totalorder %s851_s6, %s844_s16 }
  0x35   : > { %p854_p10 = por %p853_p11, %p852_p13 }
  0x37   : > { %p855_p1 = pnand %p854_p10, %p848_p9 }
  0x39   : > { %858 = shalt.err (!%p855_p1)
}
  0x3a   : > { %737 = dma.hbm_to_vmem [thread:$0]  (!%p1142_p5), %s236_s10, 128, %s239_s12, %s227_s1  }
  0x3b   : > { %247 = sbr.rel (%p1092_p8) target bundleno = 331 (0x14b), region = 32  ;;  %s1153_s14 = sand.u32 (!%p1092_p8), 1, %s983_s19  }
  0x3c   : > { %s1156_s17 = sshll.u32 (!%p1092_p8), %s1153_s14, 3  ;;  %s250_s7 = scalar_lea.sflag (!%p1092_p8), [#allocation3], %s1153_s14 }
  0x3d   : > { %s253_s29 = scalar_lea.vmem (!%p1092_p8), [#allocation2], %s1156_s17 }
  0x40   : > { %962 = dma.done.wait (%p1082_p4), %s250_s7, 128  }
  0x41   : > { %964 = vsyncadd (%p1082_p4), %s250_s7, 4294967168  ;;  %p1323_p1 = scmp.eq.s32.totalorder %s1071_s24, 0 }
  0x43   : > { %966 = dma.done.wait (%p1323_p1), [#allocation6], 1536   ;;  %p1324_p8 = pmov %p1323_p1 }
  0x44   : > { %v1005_v0 = vmov 0.0   ;;  %vm1006_vm0 = vmmov 0   ;;  %v305_v1 = vld [vmem:[#allocation5 + $0x50] sm:$0xff]  ;;  %v304_v2 = vld [vmem:[#allocation5 + $0x48] sm:$0xff]  ;;  %v302_v3 = vld [vmem:[#allocation5 + $0x38] sm:$0xff]  ;;  %vm324_vm1 = vcmask 261120   ;;  %v309_v14 = vlaneseq }
  0x45   : > { %968 = vsyncadd (%p1324_p8), [#allocation6], 4294965760  ;;  %707 = vmatprep.subr.mxu1 %v1005_v0  ;;  %392 = vmatprep.mubr.f32.mxu0 %v1005_v0  ;;  %v306_v4 = vld [vmem:[#allocation5 + $0x58] sm:$0xff]  ;;  %v301_v5 = vld [vmem:[#allocation5 + $0x30] sm:$0xff]  ;;  %s697_s28 = sshll.u32 %s991_s21, 7  ;;  %s279_s8 = scalar_lea.vmem [#allocation7], %s1156_s17 }
  0x46   : > { %715 = vmatprep.mubr.msk.f32.mxu1 %vm1006_vm0, %v1005_v0  ;;  %352 = vmatprep.subr.mxu0 %v305_v1  ;;  %v299_v6 = vld [vmem:[#allocation5 + $0x20] sm:$0xff]  ;;  %v298_v8 = vld [vmem:[#allocation5 + $0x18] sm:$0xff]  ;;  %v300_v9 = vld [vmem:[#allocation5 + $0x28] sm:$0xff]  ;;  %v310_v15 = vshrl.u32 %v309_v14, 7  ;;  %s498_s9 = sshll.u32 %s279_s8, 4  ;;  %s1309_s10 = scalar_lea.vmem [#allocation8], %s1156_s17  ;;  %s1187_s9 = int_to_ptr.vmem [resolvable:$true] %s498_s9 }
  0x47   : > { %353 = vmatpush1.msra.mxu0 %v304_v2  ;;  %708 = vmatpush3.msra.mxu1 %v306_v4  ;;  %v303_v7 = vld [vmem:[#allocation5 + $0x40] sm:$0xff]  ;;  %v296_v10 = vld [vmem:[#allocation5 + $0x8] sm:$0xff]  ;;  %v297_v12 = vld [vmem:[#allocation5 + $0x10] sm:$0xff]  ;;  %s512_s11 = sshll.u32 %s1309_s10, 4  ;;  %vm469_vm2 = vcmask 130048   ;;  %s293_s12 = scalar_lea.vmem [#allocation10], %s1156_s17  ;;  %s1194_s11 = int_to_ptr.vmem [resolvable:$true] %s512_s11 }
  0x48   : > { %354 = vmatprep.subr.mxu0 %v302_v3  ;;  %709 = vmatprep.subr.mxu1 %v1005_v0  ;;  %v295_v11 = vld [vmem:[#allocation5] sm:$0xff]  ;;  %v294_v13 = vld [vmem:[%s253_s29] sm:$0xff]  ;;  %v311_v16 = vsub.s32 0, %v310_v15  ;;  %v319_v17 = vsub.s32 2, %v310_v15  ;;  %v315_v19 = vsub.s32 1, %v310_v15  ;;  %s526_s16 = sshll.u32 %s293_s12, 4  ;;  %s1185_s7 = scalar_lea.hbm %s1303_s3, %s697_s28  ;;  %s1203_s16 = int_to_ptr.vmem [resolvable:$true] %s526_s16 }
  0x49   : > { %355 = vmatpush1.msra.mxu0 %v301_v5  ;;  %710 = vmatpush3.msra.mxu1 %v303_v7  ;;  %v307_v18 = vld [vmem:[%s1302_s2] sm:$0x7]  ;;  %s1192_s1 = scalar_lea.hbm %s1304_s4, %s697_s28  ;;  %s1201_s6 = scalar_lea.hbm %s1305_s5, %s697_s28 }
  0x4a   : > { %356 = vmatprep.subr.mxu0 %v299_v6  ;;  %711 = vmatprep.subr.mxu1 %v1005_v0  ;;  %v312_v20 = vrot.slane %v307_v18, %v311_v16  ;;  %v320_v21 = vrot.slane %v307_v18, %v319_v17  ;;  %v316_v22 = vrot.slane %v307_v18, %v315_v19  ;;  %s474_s26 = scalar_lea.sflag [#allocation4], %s1153_s14  ;;  %s859_s10 = scalar_lea.vmem %s1187_s9, 128 }
  0x4b   : > { %357 = vmatpush1.msra.mxu0 %v298_v8  ;;  %712 = vmatpush3.msra.mxu1 %v300_v9  ;;  %p860_p4 = scmp.ne.s32.totalorder %s1187_s9, %s859_s10  ;;  %s1007_s21 = smov [#allocation7]  }
  0x4c   : > { %358 = vmatprep.subr.mxu0 %v296_v10  ;;  %713 = vmatprep.subr.mxu1 %v1005_v0  ;;  %s863_s29 = sshll.u32 %s1007_s21, 4  ;;  %s864_s29 = int_to_ptr.vmem [resolvable:$false] %s863_s29 }
  0x4d   : > { %359 = vmatpush1.msra.mxu0 %v295_v11  ;;  %714 = vmatpush3.msra.mxu1 %v297_v12  ;;  %p861_p10 = pnand %p860_p4, %p1125_p0  ;;  %s865_s0 = scalar_lea.vmem %s864_s29, 256 }
  0x4e   : > { %692 = vmatmul.mubr.msk.f32.vlgmr.msra.gmra.mxu0 %vm324_vm1, %v294_v13  ;;  %716 = vmatmul.mubr.msk.f32.vlgmr.msra.gmra.mxu1 %vm324_vm1, %v294_v13  ;;  %p866_p3 = scmp.lt.s32.totalorder %s1187_s9, %s864_s29  ;;  %p867_p5 = scmp.lt.s32.totalorder %s865_s0, %s859_s10 }
  0x4f   : > { %p862_p12 = pneg %p861_p10 }
  0x50   : > { %p868_p7 = por %p867_p5, %p866_p3 }
  0x52   : > { %p869_p2 = pnand %p868_p7, %p862_p12 }
 0x10e   : > { %v394_v23 = vpop.f32.mrf.mxu0  ;;  %v465_v24 = vpop.f32.mrf.mxu1 }
 0x10f   : > { %v395_v25 = vadd.f32 %v394_v23, %v312_v20  ;;  %v466_v26 = vadd.f32 %v465_v24, %v320_v21 }
 0x110   : > { %v396_v27 = vpop.f32.mrf.mxu0  ;;  %v717_v28 = vpop.f32.mrf.mxu1 }
 0x111   : > { %v397_v29 = vadd.f32 %v396_v27, %v316_v22  ;;  %470 = vst.msk [vmem:[%s279_s8] sm:$0xff] %vm469_vm2, %v395_v25 }
 0x112   : > { %472 = vst.msk [vmem:[%s293_s12] sm:$0xff] %vm324_vm1, %v466_v26 }
 0x113   : > { %872 = shalt.err (!%p869_p2)
}
 0x114   : > { %s873_s28 = scalar_lea.hbm %s1185_s7, 128  ;;  %s877_s12 = scalar_lea.hbm %s1303_s3, 256 }
 0x115   : > { %p874_p6 = scmp.ne.s32.totalorder %s1185_s7, %s873_s28  ;;  %p878_p11 = scmp.lt.s32.totalorder %s1185_s7, %s1303_s3 }
 0x116   : > { %p879_p1 = scmp.lt.s32.totalorder %s877_s12, %s873_s28 }
 0x117   : > { %p875_p9 = pnand %p874_p6, %p1125_p0 }
 0x118   : > { %p880_p8 = por %p879_p1, %p878_p11 }
 0x119   : > { %p876_p13 = pneg %p875_p9 }
 0x11b   : > { %p881_p4 = pnand %p880_p8, %p876_p13 }
 0x11d   : > { %884 = shalt.err (!%p881_p4)
}
 0x11e   : > { %724 = dma.vmem_to_hbm [thread:$0]  (%p1125_p0), %s1187_s9, 128, %s1185_s7, %s474_s26  }
 0x11f   : > { %s1325_s0 = scalar_lea.vmem [#allocation8], %s1156_s17  ;;  %s1326_s10 = sand.u32 1, %s1071_s24  }
 0x120   : > { %471 = vst.msk [vmem:[%s1325_s0] sm:$0xff] %vm469_vm2, %v397_v29  ;;  %s1231_s21 = scalar_lea.sflag [#allocation9], %s1326_s10  ;;  %s885_s29 = scalar_lea.vmem %s1194_s11, 128 }
 0x121   : > { %p886_p10 = scmp.ne.s32.totalorder %s1194_s11, %s885_s29  ;;  %s1008_s28 = smov [#allocation8]  }
 0x122   : > { %s889_s14 = sshll.u32 %s1008_s28, 4  ;;  %s890_s14 = int_to_ptr.vmem [resolvable:$false] %s889_s14 }
 0x123   : > { %p887_p12 = pnand %p886_p10, %p1125_p0  ;;  %s891_s8 = scalar_lea.vmem %s890_s14, 256 }
 0x124   : > { %p892_p5 = scmp.lt.s32.totalorder %s1194_s11, %s890_s14  ;;  %p893_p7 = scmp.lt.s32.totalorder %s891_s8, %s885_s29 }
 0x125   : > { %p888_p3 = pneg %p887_p12 }
 0x126   : > { %p894_p2 = por %p893_p7, %p892_p5 }
 0x128   : > { %p895_p6 = pnand %p894_p2, %p888_p3 }
 0x12a   : > { %898 = shalt.err (!%p895_p6)
}
 0x12b   : > { %s899_s24 = scalar_lea.hbm %s1192_s1, 128  ;;  %s903_s9 = scalar_lea.hbm %s1304_s4, 256 }
 0x12c   : > { %p900_p9 = scmp.ne.s32.totalorder %s1192_s1, %s899_s24  ;;  %p904_p1 = scmp.lt.s32.totalorder %s1192_s1, %s1304_s4 }
 0x12d   : > { %p905_p8 = scmp.lt.s32.totalorder %s903_s9, %s899_s24 }
 0x12e   : > { %p901_p13 = pnand %p900_p9, %p1125_p0 }
 0x12f   : > { %p906_p4 = por %p905_p8, %p904_p1 }
 0x130   : > { %p902_p11 = pneg %p901_p13 }
 0x132   : > { %p907_p10 = pnand %p906_p4, %p902_p11 }
 0x134   : > { %910 = shalt.err (!%p907_p10)
}
 0x135   : > { %725 = dma.vmem_to_hbm [thread:$0]  (%p1125_p0), %s1194_s11, 128, %s1192_s1, %s1231_s21  }
 0x136   : > { %s911_s25 = scalar_lea.vmem %s1203_s16, 128  ;;  %s1009_s13 = smov [#allocation10]  }
 0x137   : > { %p912_p12 = scmp.ne.s32.totalorder %s1203_s16, %s911_s25  ;;  %s915_s0 = sshll.u32 %s1009_s13, 4  ;;  %s916_s0 = int_to_ptr.vmem [resolvable:$false] %s915_s0 }
 0x138   : > { %s917_s10 = scalar_lea.vmem %s916_s0, 256  ;;  %p918_p7 = scmp.lt.s32.totalorder %s1203_s16, %s916_s0 }
 0x139   : > { %p913_p3 = pnand %p912_p12, %p1125_p0  ;;  %p919_p2 = scmp.lt.s32.totalorder %s917_s10, %s911_s25 }
 0x13b   : > { %p914_p5 = pneg %p913_p3  ;;  %p920_p6 = por %p919_p2, %p918_p7 }
 0x13d   : > { %p921_p9 = pnand %p920_p6, %p914_p5 }
 0x13f   : > { %924 = shalt.err (!%p921_p9)
}
 0x140   : > { %s925_s29 = scalar_lea.hbm %s1201_s6, 128  ;;  %s929_s28 = scalar_lea.hbm %s1305_s5, 256 }
 0x141   : > { %p926_p13 = scmp.ne.s32.totalorder %s1201_s6, %s925_s29  ;;  %p930_p8 = scmp.lt.s32.totalorder %s1201_s6, %s1305_s5 }
 0x142   : > { %p931_p4 = scmp.lt.s32.totalorder %s929_s28, %s925_s29 }
 0x143   : > { %p927_p11 = pnand %p926_p13, %p1125_p0 }
 0x144   : > { %p932_p10 = por %p931_p4, %p930_p8 }
 0x145   : > { %p928_p1 = pneg %p927_p11 }
 0x147   : > { %p933_p12 = pnand %p932_p10, %p928_p1 }
 0x149   : > { %936 = shalt.err (!%p933_p12)
}
 0x14a   : > { %726 = dma.vmem_to_hbm [thread:$0]  (%p1125_p0), %s1203_s16, 128, %s1201_s6, %s1231_s21  }
 0x14b PF: > { %s538_s24 = sand.u32 1, %s979_s18   ;;  %p1327_p3 = scmp.ne.s32.totalorder %s1313_s27, 0 }
 0x14c   : > { %p1328_p5 = scmp.ge.s32.totalorder %s999_s23, 2  ;;  %s539_s17 = scalar_lea.sflag [#allocation4], %s538_s24 }
 0x14e   : > { %p739_p7 = pnand %p1328_p5, %p1327_p3 }
 0x150   : > { %p740_p2 = pneg %p739_p7 }
 0x152   : > { %970 = dma.done.wait (%p740_p2), %s539_s17, 128  }
 0x153   : > { %972 = vsyncadd (%p740_p2), %s539_s17, 4294967168  ;;  %s1329_s26 = sadd.s32 4294967294, %s999_s23  }
 0x154   : > { %s547_s9 = sand.u32 1, %s1329_s26  }
 0x155   : > { %s548_s15 = scalar_lea.sflag [#allocation9], %s547_s9 }
 0x156   : > { %974 = dma.done.wait (%p740_p2), %s548_s15, 256  }
 0x157   : > { %976 = vsyncadd (%p740_p2), %s548_s15, 4294967040  ;;  %s26_s23 = sadd.s32 1, %s999_s23   ;;  %s1330_s27 = sld [smem:[#allocation15_spill]] }
 0x158   : > { %p23_p0 = scmp.ge.s32.totalorder %s26_s23, 4   ;;  %s1331_s18 = smov %s983_s19 }
 0x159   : > { %s1332_s19 = smov %s987_s20  ;;  %s1333_s20 = smov %s1134_s30 }
 0x15a   : > { %s1334_s21 = smov %s995_s22  ;;  %25 = sbr.rel (!%p23_p0) target bundleno = 12 (0xc), region = 113 }
 0x15d   : > { %s1335_s22 = smov %s1330_s27 }
 0x15f   :  { %562 = vsyncpa [#allocation3], 1 }
 0x160   :  { %564 = vsyncpa [#allocation3 + $0x1], 1 }
 0x161   :  { %565 = vsyncpa [#allocation6], 1 }
 0x162   :  { %566 = vsyncpa [#allocation4], 1 }
 0x163   :  { %568 = vsyncpa [#allocation4 + $0x1], 1 }
 0x164   :  { %569 = vsyncpa [#allocation9], 1 }
 0x165   :  { %571 = vsyncpa [#allocation9 + $0x1], 1 }

</bundles_post_ra>
